<compile_context>
chip_gen: v7x
topology: tpu7x:2x2x1
jax: 0.10.0
libtpu: 0.0.40
codegen_flags: <defaults>
</compile_context>

<pallas_src>
import jax
import jax.numpy as jnp
from jax import lax
from jax.experimental import pallas as pl
from jax.experimental.pallas import tpu as pltpu


def _classif_bil_antisym_kernel(x_ref, wc_ref, bw_ref, out_ref):
    # x_ref  : (TB, 2D)   X batch tile (pipelined over the batch grid)
    # wc_ref : (2Rp, 2D)  interleaved [W | AW] weight (resident, constant map)
    # bw_ref : (2Rp, 1)   bias projection [W@b ; AW@b] (resident)
    # out_ref: (1, TB)    lane-dense output row
    #
    # Single MXU matmul, contracted over the feature axis of both operands so
    # the result comes out batch-on-lanes: (2Rp, TB).
    proj = lax.dot_general(
        wc_ref[...], x_ref[...],
        dimension_numbers=(((1,), (1,)), ((), ())),
        preferred_element_type=jnp.float32)            # (2Rp, TB)

    proj = proj - bw_ref[...]                          # fold-in of (x - bias)

    rp = proj.shape[0] // 2                            # static, multiple of 8
    p0 = proj[:rp, :]                                  # x0 projections
    p1 = proj[rp:, :]                                  # x1 (antisym) projections

    # Bilinear reduction over the (padded) rank: sublane reduce, lane-dense.
    out_ref[...] = jnp.sum(p0 * p1, axis=0, keepdims=True).astype(out_ref.dtype)


def _tiling(batch, dim, rp):
    """Pick the batch tile (multiple of 128), padded batch, grid size, and a
    generation-aware VMEM limit."""
    row_bytes = 2 * dim * 4                       # one Xflat row in f32
    try:
        vmem_cap = int(pltpu.get_tpu_info().vmem_capacity_bytes)
    except Exception:
        vmem_cap = 64 * 1024 * 1024               # conservative (v7x per-TC)

    # ~30% of physical VMEM for the double-buffered X tiles.
    budget = int(0.30 * vmem_cap)
    cap_blocks = budget // (2 * row_bytes * 128)  # 128-row blocks per tile
    cap_blocks = max(1, min(cap_blocks, 16))      # 128 .. 2048 rows per tile
    # TODO(synk): if a single 128-row block overflows the budget (very large
    # dim), tile the feature axis as an extra reduction grid dimension instead
    # of relying on one oversized block.

    blocks = -(-batch // 128)                     # ceil(batch / 128)
    if blocks <= 1:
        per_tile = 1
    else:
        # >= 2 grid steps so the "parallel" batch axis can shard across the
        # two TensorCores on v7x (negligible extra step cost elsewhere).
        per_tile = min(cap_blocks, -(-blocks // 2))
    num_tiles = -(-blocks // per_tile)
    tb = per_tile * 128
    b_pad = num_tiles * tb

    dbuf_in = 2 * tb * row_bytes                  # double-buffered X tile
    const_bytes = 2 * ((2 * rp) * (2 * dim) * 4 + (2 * rp) * 4 + tb * 4)
    vmem_limit = dbuf_in + const_bytes + (4 << 20)
    vmem_limit = max(vmem_limit, 32 << 20)
    vmem_limit = min(vmem_limit, vmem_cap - (16 << 20))
    return tb, b_pad, num_tiles, int(vmem_limit)


def classif_bil_antisym_2(X, weight, antisym, bias_vecto):
    """Forward pass of torchmodule_Classif_Bil_Antisym_2.

    X          : (batch, dim, 2) float32
    weight     : (rang, dim)     float32
    antisym    : (rang // 2,)    float32
    bias_vecto : (dim,)          float32
    returns    : (batch,)        float32
    """
    batch, dim, two = X.shape
    assert two == 2
    rang = weight.shape[0]
    assert rang % 2 == 0 and weight.shape[1] == dim
    f32 = jnp.float32

    # ---- one-time parameter glue in XLA (all hoisted out of the kernel) ----
    W = weight.astype(f32)
    r = jnp.arange(rang)
    idx = 2 * (r // 2) + 1 - r % 2                # pairwise row swap
    av = (antisym.astype(f32)[:, None]
          * jnp.array([[1.0, -1.0]], dtype=f32)).reshape(rang)
    AW = av[:, None] * W[idx, :]                  # (rang, dim)

    rp = max(8, ((rang + 7) // 8) * 8)            # sublane-aligned rank padding

    # Interleaved combined weight: Xflat column 2*d is X[:, d, 0], column
    # 2*d+1 is X[:, d, 1].  Rows [0, rang) project x0 with W, rows
    # [rp, rp+rang) project x1 with AW; padding rows are zero.
    Wcat = jnp.zeros((2 * rp, 2 * dim), f32)
    Wcat = Wcat.at[:rang, 0::2].set(W)
    Wcat = Wcat.at[rp:rp + rang, 1::2].set(AW)

    bias = bias_vecto.astype(f32)
    bw = jnp.zeros((2 * rp, 1), f32)
    bw = bw.at[:rang, 0].set(W @ bias)
    bw = bw.at[rp:rp + rang, 0].set(AW @ bias)

    # Constant bias-bias bilinear term (analytically zero; kept for fidelity).
    tbmb = jnp.sum((W @ bias) * (AW @ bias))

    # ---- input: free row-major reshape, no x0/x1 materialization -----------
    Xflat = X.astype(f32).reshape(batch, 2 * dim)

    tb, b_pad, num_tiles, vmem_limit = _tiling(batch, dim, rp)
    if b_pad != batch:
        Xflat = jnp.pad(Xflat, ((0, b_pad - batch), (0, 0)))

    flops = 2 * b_pad * (2 * dim) * (2 * rp) + 3 * b_pad * rp
    bytes_accessed = 4 * (b_pad * 2 * dim + 2 * rp * 2 * dim + 2 * rp + b_pad)

    out = pl.pallas_call(
        _classif_bil_antisym_kernel,
        out_shape=jax.ShapeDtypeStruct((1, b_pad), f32),
        grid=(num_tiles,),
        in_specs=[
            pl.BlockSpec((tb, 2 * dim), lambda i: (i, 0)),      # X tile (pipelined)
            pl.BlockSpec((2 * rp, 2 * dim), lambda i: (0, 0)),  # Wcat (resident)
            pl.BlockSpec((2 * rp, 1), lambda i: (0, 0)),        # bias proj (resident)
        ],
        out_specs=pl.BlockSpec((1, tb), lambda i: (0, i)),      # lane-dense output
        compiler_params=pltpu.CompilerParams(
            dimension_semantics=("parallel",),
            vmem_limit_bytes=vmem_limit),
        cost_estimate=pl.CostEstimate(
            flops=int(flops), transcendentals=0,
            bytes_accessed=int(bytes_accessed)),
    )(Xflat, Wcat, bw)

    # Padded rows compute garbage ((-bias)W ⊙ (-bias)AW) but are sliced off.
    return out[0, :batch] + tbmb


def _reference(X, weight, antisym, bias_vecto):
    """Pure-JAX reference mirroring the PyTorch forward (sanity check)."""
    rang, dim = weight.shape
    av = (antisym[:, None] * jnp.array([[1.0, -1.0]], dtype=weight.dtype)
          ).reshape(rang)[:, None]
    idx = jnp.arange(rang)
    idx = 2 * (idx // 2) + 1 - idx % 2
    aw = av * weight[idx, :]                     # (rang, dim)
    B = bias_vecto[None, :, None]                # (1, dim, 1)
    Xb = X - B
    x1b = Xb[..., 1][..., None]                  # (batch, dim, 1)
    x0b = Xb[..., 0][..., None]
    wx0b = jnp.matmul(weight[None], x0b)         # (batch, rang, 1)
    awx1b = jnp.matmul(aw[None], x1b)            # (batch, rang, 1)
    Y = (wx0b * awx1b).reshape(-1, rang).sum(axis=1)
    awb = jnp.matmul(aw[None], B)
    wb = jnp.matmul(weight[None], B)
    tbmb = (wb * awb).reshape(-1, rang).sum(axis=1)
    return Y + tbmb


if __name__ == "__main__":
    key = jax.random.PRNGKey(0)

    def make_inputs(key, batch, dim, rang):
        k_x, k_w, k_a, k_b = jax.random.split(key, 4)
        X = jax.random.normal(k_x, (batch, dim, 2), dtype=jnp.float32)
        xavier_std = (2.0 / (rang + dim)) ** 0.5
        weight = xavier_std * jax.random.normal(k_w, (rang, dim), dtype=jnp.float32)
        antisym = jax.random.normal(k_a, (rang // 2,), dtype=jnp.float32)
        bias_vecto = jax.random.normal(k_b, (dim,), dtype=jnp.float32)
        return X, weight, antisym, bias_vecto

    # Small shape consistent with the module (single batch tile).
    batch, dim, rang = 8, 32, 4
    X, weight, antisym, bias_vecto = make_inputs(key, batch, dim, rang)
    y = jax.block_until_ready(classif_bil_antisym_2(X, weight, antisym, bias_vecto))
    y_ref = _reference(X, weight, antisym, bias_vecto)
    assert y.shape == (batch,)
    assert jnp.allclose(y, y_ref, atol=1e-4, rtol=1e-4), (y, y_ref)

    # Second shape exercising the tiled / padded multi-grid-step path.
    batch2 = 600
    X2, w2, a2, b2 = make_inputs(jax.random.PRNGKey(1), batch2, dim, rang)
    y2 = jax.block_until_ready(classif_bil_antisym_2(X2, w2, a2, b2))
    y2_ref = _reference(X2, w2, a2, b2)
    assert y2.shape == (batch2,)
    assert jnp.allclose(y2, y2_ref, atol=1e-4, rtol=1e-4)

    print("KERNEL_OK")
</pallas_src>

<mosaic_0001>
module attributes {stable_mosaic.version = 11 : i64} {
  func.func @_classif_bil_antisym_kernel(%arg0: i32, %arg1: memref<128x64xf32, #tpu.memory_space<vmem>>, %arg2: memref<16x64xf32, #tpu.memory_space<vmem>>, %arg3: memref<16x1xf32, #tpu.memory_space<vmem>>, %arg4: memref<1x128xf32, #tpu.memory_space<vmem>>) attributes {dimension_semantics = [#tpu.dimension_semantics<parallel>], iteration_bounds = array<i64: 1>, scalar_prefetch = 0 : i64, scratch_operands = 0 : i64, tpu.core_type = #tpu.core_type<tc>, window_params = [{transform_indices = @transform_0, window_bounds = array<i64: 128, 64>}, {pipeline_mode = #tpu.pipeline_mode<synchronous>, transform_indices = @transform_1, window_bounds = array<i64: 16, 64>}, {pipeline_mode = #tpu.pipeline_mode<synchronous>, transform_indices = @transform_2, window_bounds = array<i64: 16, 1>}, {transform_indices = @transform_3, window_bounds = array<i64: 1, 128>}]} {
    %c0 = arith.constant 0 : index
    %c0_0 = arith.constant 0 : index
    %0 = vector.load %arg2[%c0, %c0_0] : memref<16x64xf32, #tpu.memory_space<vmem>>, vector<16x64xf32>
    %c0_1 = arith.constant 0 : index
    %c0_2 = arith.constant 0 : index
    %1 = vector.load %arg1[%c0_1, %c0_2] : memref<128x64xf32, #tpu.memory_space<vmem>>, vector<128x64xf32>
    %cst = arith.constant dense<0.000000e+00> : vector<16x128xf32>
    %2 = tpu.matmul %0, %1, %cst {dimension_numbers = #tpu.dot_dimension_numbers<[1], [1], [0], [0], [0, 0, 1, 0], [], []>} : vector<16x64xf32>, vector<128x64xf32>, vector<16x128xf32> -> vector<16x128xf32>
    %c0_3 = arith.constant 0 : index
    %c0_4 = arith.constant 0 : index
    %3 = vector.load %arg3[%c0_3, %c0_4] : memref<16x1xf32, #tpu.memory_space<vmem>>, vector<16x1xf32>
    %4 = vector.broadcast %3 : vector<16x1xf32> to vector<16x128xf32>
    %5 = arith.subf %2, %4 : vector<16x128xf32>
    %6 = vector.extract_strided_slice %5 {offsets = [0, 0], sizes = [8, 128], strides = [1, 1]} : vector<16x128xf32> to vector<8x128xf32>
    %7 = vector.extract_strided_slice %5 {offsets = [8, 0], sizes = [8, 128], strides = [1, 1]} : vector<16x128xf32> to vector<8x128xf32>
    %8 = arith.mulf %6, %7 : vector<8x128xf32>
    %cst_5 = arith.constant dense<0.000000e+00> : vector<128xf32>
    %9 = vector.multi_reduction <add>, %8, %cst_5 [0] : vector<8x128xf32> to vector<128xf32>
    %10 = vector.shape_cast %9 : vector<128xf32> to vector<1x128xf32>
    %c0_6 = arith.constant 0 : index
    %c0_7 = arith.constant 0 : index
    %11 = vector.load %arg4[%c0_6, %c0_7] : memref<1x128xf32, #tpu.memory_space<vmem>>, vector<1x128xf32>
    tpu.vector_store %arg4[%c0_6, %c0_7], %10 {strides = array<i32>} : memref<1x128xf32, #tpu.memory_space<vmem>>, vector<1x128xf32>,
    return
  }
  func.func @transform_0(%arg0: i32) -> (i32, i32) {
    %c0_i32 = arith.constant 0 : i32
    %c0_i32_0 = arith.constant 0 : i32
    return %arg0, %c0_i32 : i32, i32
  }
  func.func @transform_1(%arg0: i32) -> (i32, i32) {
    %c0_i32 = arith.constant 0 : i32
    %c0_i32_0 = arith.constant 0 : i32
    %c0_i32_1 = arith.constant 0 : i32
    return %c0_i32, %c0_i32_0 : i32, i32
  }
  func.func @transform_2(%arg0: i32) -> (i32, i32) {
    %c0_i32 = arith.constant 0 : i32
    %c0_i32_0 = arith.constant 0 : i32
    %c0_i32_1 = arith.constant 0 : i32
    return %c0_i32, %c0_i32_0 : i32, i32
  }
  func.func @transform_3(%arg0: i32) -> (i32, i32) {
    %c0_i32 = arith.constant 0 : i32
    %c0_i32_0 = arith.constant 0 : i32
    return %c0_i32, %arg0 : i32, i32
  }
}

</mosaic_0001>

<bundles_post_ra>
// kernel: tpu_custom_call.1
= control target key start
LH: loop header
LB: loop body
LE: loop exit
PB: predicated region body
PF: predicated region fallthrough
CT: control target
= control target key end

     0   :  { %vm33_vm0 = vcmask 523264   ;;  %v345_v6 = vmov 0   ;;  %s479_s0 = inlined_call_operand.vmem [shape: f32[128,64], index: 0, kind: input, shape index: {}]   ;;  %s480_s1 = inlined_call_operand.vmem [shape: f32[16,64], index: 1, kind: input, shape index: {}]   ;;  %s481_s2 = inlined_call_operand.vmem [shape: f32[16,1], index: 2, kind: input, shape index: {}]   ;;  %s482_s3 = inlined_call_operand.hbm [shape: f32[1,128], index: 3, kind: output, shape index: {}]  }
   0x1   :  { %v17_v0 = vld [vmem:[%s479_s0] sm:$0xff]  ;;  %v18_v1 = vld [vmem:[%s479_s0 + $0x8] sm:$0xff]  ;;  %v19_v2 = vld [vmem:[%s479_s0 + $0x10] sm:$0xff]  ;;  %320 = vset.pattern.permute.xlu0 %v345_v6 }
   0x2   :  { %v270_v3 = vpack.c.bf16 %v18_v1, %v17_v0  ;;  %vm378_vm1 = vmpackc.low %vm33_vm0, %vm33_vm0  ;;  %v20_v5 = vld [vmem:[%s479_s0 + $0x18] sm:$0xff]  ;;  %v15_v8 = vld [vmem:[%s480_s1] sm:$0xff] }
   0x3   :  { %v276_v7 = vpack.c.bf16 %v20_v5, %v19_v2  ;;  %v21_v9 = vld [vmem:[%s479_s0 + $0x20] sm:$0xff]  ;;  %v22_v10 = vld [vmem:[%s479_s0 + $0x28] sm:$0xff]  ;;  %267 = vmatprep.mubr.msk.f32.mxu0 %vm33_vm0, %v15_v8 }
   0x4   :  { %272 = vmatprep.subr.msk.bf16.mxu0 %vm378_vm1, %v270_v3  ;;  %v163_v11 = vld [vmem:[%s481_s2] sm:$0xff] }
   0x5   :  { %275 = vmatpush3.bf16.xpose.msk.msra.mxu0 %vm378_vm1, %v270_v3  ;;  %167 = vperm.xlu0 %320, %v163_v11  }
   0x6   :  { %278 = vmatprep.subr.msk.bf16.mxu0 %vm378_vm1, %v276_v7 }
   0x7   :  { %8 = vsyncpa [#allocation3], 0  ;;  %v164_v12 = vld [vmem:[%s481_s2 + $0x8] sm:$0xff]  ;;  %v282_v13 = vpack.c.bf16 %v22_v10, %v21_v9  ;;  %v23_v14 = vld [vmem:[%s479_s0 + $0x30] sm:$0xff] }
   0x8   :  { %v24_v15 = vld [vmem:[%s479_s0 + $0x38] sm:$0xff]  ;;  %v25_v17 = vld [vmem:[%s479_s0 + $0x40] sm:$0xff]  ;;  %v26_v18 = vld [vmem:[%s479_s0 + $0x48] sm:$0xff] }
   0x9   :  { %172 = vperm.xlu0 %320, %v164_v12   ;;  %v288_v16 = vpack.c.bf16 %v24_v15, %v23_v14  ;;  %v294_v19 = vpack.c.bf16 %v26_v18, %v25_v17  ;;  %v27_v20 = vld [vmem:[%s479_s0 + $0x50] sm:$0xff]  ;;  %v28_v21 = vld [vmem:[%s479_s0 + $0x58] sm:$0xff]  ;;  %v29_v23 = vld [vmem:[%s479_s0 + $0x60] sm:$0xff] }
   0xa   :  { %v300_v22 = vpack.c.bf16 %v28_v21, %v27_v20  ;;  %v30_v24 = vld [vmem:[%s479_s0 + $0x68] sm:$0xff]  ;;  %v31_v26 = vld [vmem:[%s479_s0 + $0x70] sm:$0xff]  ;;  %v32_v27 = vld [vmem:[%s479_s0 + $0x78] sm:$0xff]  ;;  %s346_s0 = smov [#allocation2]  }
   0xb   :  { %v306_v25 = vpack.c.bf16 %v30_v24, %v29_v23  ;;  %v312_v28 = vpack.c.bf16 %v32_v27, %v31_v26  ;;  %v16_v29 = vld [vmem:[%s480_s1 + $0x8] sm:$0xff]  ;;  %s191_s24 = sshll.u32 %s346_s0, 4  ;;  %s192_s24 = int_to_ptr.vmem [resolvable:$true] %s191_s24 }
   0xc   :  { %s321_s1 = scalar_lea.vmem %s192_s24, 16  ;;  %s325_s25 = scalar_lea.vmem %s192_s24, 32 }
   0xd   :  { %281 = vmatpush3.bf16.xpose.msk.msra.mxu0 %vm378_vm1, %v276_v7  ;;  %p322_p0 = scmp.ne.s32.totalorder %s192_s24, %s321_s1  ;;  %p326_p1 = scmp.lt.s32.totalorder %s192_s24, %s192_s24 }
   0xe   :  { %284 = vmatprep.subr.msk.bf16.mxu0 %vm378_vm1, %v282_v13  ;;  %p327_p2 = scmp.lt.s32.totalorder %s325_s25, %s321_s1 }
  0x10   :  { %p328_p3 = por %p327_p2, %p326_p1 }
  0x12   :  { %p329_p4 = pnand %p328_p3, %p322_p0 }
  0x15   :  { %287 = vmatpush3.bf16.xpose.msk.msra.mxu0 %vm378_vm1, %v282_v13 }
  0x16   :  { %290 = vmatprep.subr.msk.bf16.mxu0 %vm378_vm1, %v288_v16 }
  0x1d   :  { %293 = vmatpush3.bf16.xpose.msk.msra.mxu0 %vm378_vm1, %v288_v16 }
  0x1e   :  { %296 = vmatprep.subr.msk.bf16.mxu0 %vm378_vm1, %v294_v19 }
  0x25   :  { %299 = vmatpush3.bf16.xpose.msk.msra.mxu0 %vm378_vm1, %v294_v19 }
  0x26   :  { %302 = vmatprep.subr.msk.bf16.mxu0 %vm378_vm1, %v300_v22 }
  0x2d   :  { %305 = vmatpush3.bf16.xpose.msk.msra.mxu0 %vm378_vm1, %v300_v22 }
  0x2e   :  { %308 = vmatprep.subr.msk.bf16.mxu0 %vm378_vm1, %v306_v25 }
  0x35   :  { %311 = vmatpush3.bf16.xpose.msk.msra.mxu0 %vm378_vm1, %v306_v25 }
  0x36   :  { %314 = vmatprep.subr.msk.bf16.mxu0 %vm378_vm1, %v312_v28 }
  0x3d   :  { %317 = vmatpush3.bf16.xpose.msk.msra.mxu0 %vm378_vm1, %v312_v28 }
  0x44   :  { %268 = vmatmul.mubr.msk.f32.vlgmr.msra.gmra.mrb[0].mxu0 %vm33_vm0, %v16_v29 }
  0x84   :  { %v168_v30 = vpop.permute.xlu0 %167 }
  0x88   :  { %v173_v31 = vpop.permute.xlu0 %172 }
 0x117   :  { %v269_v32 = vpop.f32.mrb[0].mxu0 }
 0x118   :  { %v176_v33 = vsub.f32 %v269_v32, %v173_v31  ;;  %v154_v34 = vpop.f32.mrb[1].mxu0 }
 0x119   :  { %v175_v35 = vsub.f32 %v154_v34, %v168_v30 }
 0x11b   :  { %v177_v36 = vmul.f32 %v176_v33, %v175_v35 }
 0x11d   :  { %v178_v37 = vrot.slane %v177_v36, 4 }
 0x11f   :  { %v179_v38 = vadd.f32 %v178_v37, %v177_v36 }
 0x121   :  { %v180_v39 = vrot.slane %v179_v38, 2 }
 0x123   :  { %v181_v40 = vadd.f32 %v180_v39, %v179_v38 }
 0x125   :  { %v182_v41 = vrot.slane %v181_v40, 1 }
 0x127   :  { %v183_v42 = vadd.f32 %v182_v41, %v181_v40 }
 0x129   :  { %184 = vst [vmem:[#allocation2] sm:$0x1] %v183_v42 }
 0x12a   :  { %332 = shalt.err (!%p329_p4)
}
 0x12b   :  { %s333_s28 = scalar_lea.hbm %s482_s3, 16 }
 0x12c   :  { %p334_p5 = scmp.ne.s32.totalorder %s482_s3, %s333_s28  ;;  %p337_p6 = scmp.lt.u32.totalorder %s333_s28, %s482_s3 }
 0x12e   :  { %p339_p7 = pnand %p337_p6, %p334_p5 }
 0x130   :  { %342 = shalt.err (!%p339_p7)
}
 0x131   :  { %194 = dma.vmem_to_hbm [thread:$0]  %s192_s24, 16, %s482_s3, [#allocation3]  }
 0x132   :  { %343 = dma.done.wait [#allocation3], 16  }
 0x133   :  { %344 = vsyncadd [#allocation3], 4294967280 }
 0x134   :  { %198 = vsyncpa [#allocation3], 1 }

</bundles_post_ra>
